<compile_context>
chip_gen: v7x
topology: tpu7x:2x2x1
jax: 0.10.0
libtpu: 0.0.40
codegen_flags: <defaults>
</compile_context>

<pallas_src>
import jax
import jax.numpy as jnp
from jax.experimental import pallas as pl
from jax.experimental.pallas import tpu as pltpu

EPS = 1e-5
EXPANSION = 4

# Tile sizes: 256-aligned fills the v6e/v7x 2x256^2 MXU natively, is a multiple
# of 128 for v5e's 4x128^2 MXU, and with bf16 inputs + double buffering stays
# far below v7x's 64 MiB VMEM (well under the 32 MiB scoped limit).
TM, TK, TN = 256, 256, 256
VMEM_LIMIT_BYTES = 32 * 1024 * 1024


def _round_up(x, m):
    return (x + m - 1) // m * m


def _pad2(a, rows, cols):
    return jnp.pad(a, ((0, rows - a.shape[0]), (0, cols - a.shape[1])))


def _pick_tiles(M, K, N):
    tm = min(TM, _round_up(M, 16))    # 16: bf16 sublane packing granularity
    tk = min(TK, _round_up(K, 128))   # 128: lane width
    tn = min(TN, _round_up(N, 128))
    return tm, tk, tn


# ---------------------------------------------------------------------------
# Pallas kernel (factory: optional residual input, optional preact output)
# ---------------------------------------------------------------------------
def _make_matmul_kernel(nk, relu, has_res, emit_preact):
    """out = [relu]( x @ w + bias [+ residual] ), optional preact output."""

    def kernel(*refs):
        x_ref, w_ref, b_ref = refs[0], refs[1], refs[2]
        idx = 3
        sc_ref = None
        if has_res:
            sc_ref = refs[idx]
            idx += 1
        out_ref = refs[idx]
        idx += 1
        pre_ref = None
        if emit_preact:
            pre_ref = refs[idx]
            idx += 1
        acc_ref = refs[idx]

        @pl.when(pl.program_id(2) == 0)
        def _init():
            acc_ref[...] = jnp.zeros_like(acc_ref)

        acc_ref[...] += jnp.dot(x_ref[...], w_ref[...],
                                preferred_element_type=jnp.float32)

        @pl.when(pl.program_id(2) == nk - 1)
        def _epilogue():
            y = acc_ref[...] + b_ref[...]
            if sc_ref is not None:
                y = y + sc_ref[...].astype(jnp.float32)
            if pre_ref is not None:
                pre_ref[...] = y.astype(pre_ref.dtype)
            if relu:
                y = jnp.maximum(y, 0.0)
            out_ref[...] = y.astype(out_ref.dtype)

    return kernel


def fused_matmul(x, w, bias, *, relu, shortcut=None, emit_preact=False,
                 out_dtype=jnp.float32):
    """Tiled (x @ w) + bias [+ shortcut] [+relu] with bf16 MXU inputs.

    x: (M, K), w: (K, N), bias: (N,), shortcut: (M, N) or None.
    Returns (M, N) [out_dtype]; if emit_preact also returns f32 pre-activation.
    """
    M, K = x.shape
    N = w.shape[1]
    tm, tk, tn = _pick_tiles(M, K, N)
    Mp, Kp, Np = _round_up(M, tm), _round_up(K, tk), _round_up(N, tn)
    nk = Kp // tk

    xp = _pad2(x.astype(jnp.bfloat16), Mp, Kp)
    wp = _pad2(w.astype(jnp.bfloat16), Kp, Np)
    bp = _pad2(bias.reshape(1, N).astype(jnp.float32), 1, Np)

    in_specs = [
        pl.BlockSpec((tm, tk), lambda i, j, k: (i, k)),
        pl.BlockSpec((tk, tn), lambda i, j, k: (k, j)),
        pl.BlockSpec((1, tn), lambda i, j, k: (0, j)),
    ]
    args = [xp, wp, bp]
    if shortcut is not None:
        scp = _pad2(shortcut.astype(jnp.float32), Mp, Np)
        in_specs.append(pl.BlockSpec((tm, tn), lambda i, j, k: (i, j)))
        args.append(scp)

    out_block = pl.BlockSpec((tm, tn), lambda i, j, k: (i, j))
    if emit_preact:
        out_shape = (jax.ShapeDtypeStruct((Mp, Np), out_dtype),
                     jax.ShapeDtypeStruct((Mp, Np), jnp.float32))
        out_specs = (out_block, out_block)
    else:
        out_shape = jax.ShapeDtypeStruct((Mp, Np), out_dtype)
        out_specs = out_block

    kernel = _make_matmul_kernel(nk, relu, shortcut is not None, emit_preact)

    res = pl.pallas_call(
        kernel,
        out_shape=out_shape,
        grid_spec=pltpu.PrefetchScalarGridSpec(
            num_scalar_prefetch=0,
            grid=(Mp // tm, Np // tn, nk),
            in_specs=in_specs,
            out_specs=out_specs,
            scratch_shapes=[pltpu.VMEM((tm, tn), jnp.float32)],
        ),
        compiler_params=pltpu.CompilerParams(
            dimension_semantics=("parallel", "parallel", "arbitrary"),
            vmem_limit_bytes=VMEM_LIMIT_BYTES,
        ),
    )(*args)

    if emit_preact:
        out, pre = res
        return out[:M, :N], pre[:M, :N]
    return res[:M, :N]


# ---------------------------------------------------------------------------
# Glue (plain JAX): BN folding, im2col, layouts
# ---------------------------------------------------------------------------
def _fold_bn(gamma, beta, mean, var):
    scale = gamma / jnp.sqrt(var + EPS)
    bias = beta - mean * scale
    return scale, bias


def _im2col_3x3(x_nhwc, stride):
    """x:(N,H,W,C) -> (N,Ho,Wo,9*C), padding=1, given stride."""
    # TODO(synk): fold the 9-tap reduction into the conv2 kernel's K grid axis
    # (shifted-window index_map / scalar-prefetched tap offsets) so the 9x
    # expanded tensor never materializes in HBM.
    N, H, W, C = x_nhwc.shape
    Ho = (H + 2 - 3) // stride + 1
    Wo = (W + 2 - 3) // stride + 1
    xp = jnp.pad(x_nhwc, ((0, 0), (1, 1), (1, 1), (0, 0)))
    patches = []
    for dy in range(3):
        for dx in range(3):
            patches.append(
                xp[:, dy:dy + (Ho - 1) * stride + 1:stride,
                       dx:dx + (Wo - 1) * stride + 1:stride, :])
    return jnp.concatenate(patches, axis=-1), Ho, Wo


def bottleneck_forward_nhwc(x_nhwc, params, stride, is_last):
    """Bottleneck forward with channels-last activations end-to-end."""
    N, H, W, in_planes = x_nhwc.shape
    planes = params['w1'].shape[0]
    out_planes = EXPANSION * planes
    x = x_nhwc.astype(jnp.float32)

    # ---- conv1 (1x1) + BN1 + ReLU --------------------------------------
    s1, b1 = _fold_bn(*params['bn1'])
    w1 = jnp.transpose(params['w1'][:, :, 0, 0], (1, 0)) * s1[None, :]
    out1 = fused_matmul(x.reshape(N * H * W, in_planes), w1, b1,
                        relu=True, out_dtype=jnp.bfloat16)
    out1 = out1.reshape(N, H, W, planes)

    # ---- conv2 (3x3, stride, pad=1) + BN2 + ReLU ------------------------
    cols, Ho, Wo = _im2col_3x3(out1, stride)
    s2, b2 = _fold_bn(*params['bn2'])
    w2 = jnp.transpose(params['w2'], (2, 3, 1, 0)).reshape(9 * planes, planes)
    w2 = w2 * s2[None, :]
    out2 = fused_matmul(cols.reshape(N * Ho * Wo, 9 * planes), w2, b2,
                        relu=True, out_dtype=jnp.bfloat16)

    # ---- conv3 (1x1) + BN3 + shortcut + add + ReLU (single fused call) --
    s3, b3 = _fold_bn(*params['bn3'])
    w3 = jnp.transpose(params['w3'][:, :, 0, 0], (1, 0)) * s3[None, :]

    if stride != 1 or in_planes != out_planes:
        # Projection shortcut: fuse it as a second K-segment of the same matmul.
        # TODO(synk): express the strided spatial downsample via the BlockSpec
        # index_map instead of a JAX strided slice.
        x_s = x[:, ::stride, ::stride, :].reshape(N * Ho * Wo, in_planes)
        ss, bs = _fold_bn(*params['bns'])
        ws = jnp.transpose(params['ws'][:, :, 0, 0], (1, 0)) * ss[None, :]
        x_cat = jnp.concatenate([out2, x_s.astype(jnp.bfloat16)], axis=1)
        w_cat = jnp.concatenate([w3, ws], axis=0)
        res = fused_matmul(x_cat, w_cat, b3 + bs, relu=True,
                           emit_preact=is_last, out_dtype=jnp.float32)
    else:
        # Identity shortcut: added inside the kernel epilogue.
        shortcut = x.reshape(N * Ho * Wo, out_planes)
        res = fused_matmul(out2, w3, b3, relu=True, shortcut=shortcut,
                           emit_preact=is_last, out_dtype=jnp.float32)

    if is_last:
        out, preact = res
        return (out.reshape(N, Ho, Wo, out_planes),
                preact.reshape(N, Ho, Wo, out_planes))
    return res.reshape(N, Ho, Wo, out_planes)


def bottleneck_forward(x_nchw, params, stride, is_last):
    """NCHW boundary wrapper (PyTorch semantics). For chained blocks prefer
    bottleneck_forward_nhwc to avoid per-block layout transposes."""
    x = jnp.transpose(x_nchw, (0, 2, 3, 1))
    res = bottleneck_forward_nhwc(x, params, stride, is_last)
    if is_last:
        out, preact = res
        return (jnp.transpose(out, (0, 3, 1, 2)),
                jnp.transpose(preact, (0, 3, 1, 2)))
    return jnp.transpose(res, (0, 3, 1, 2))


# ---------------------------------------------------------------------------
# Reference (plain JAX, f32, for verification)
# ---------------------------------------------------------------------------
def ref_forward(x_nchw, p, stride, in_planes, planes):
    def conv(x, w, s=1, pad=0):
        return jax.lax.conv_general_dilated(
            x, w, (s, s), [(pad, pad), (pad, pad)],
            dimension_numbers=('NCHW', 'OIHW', 'NCHW'))

    def bn(x, stats):
        gamma, beta, mean, var = stats
        s = gamma / jnp.sqrt(var + EPS)
        return x * s[None, :, None, None] + (beta - mean * s)[None, :, None, None]

    out = jax.nn.relu(bn(conv(x_nchw, p['w1']), p['bn1']))
    out = jax.nn.relu(bn(conv(out, p['w2'], stride, 1), p['bn2']))
    out = bn(conv(out, p['w3']), p['bn3'])
    if stride != 1 or in_planes != EXPANSION * planes:
        sc = bn(conv(x_nchw, p['ws'], stride), p['bns'])
    else:
        sc = x_nchw
    preact = out + sc
    return jax.nn.relu(preact), preact


# ---------------------------------------------------------------------------
def make_params(key, in_planes, planes):
    out_planes = EXPANSION * planes
    ks = jax.random.split(key, 8)

    def bn_stats(k, c):
        k1, k2, k3, k4 = jax.random.split(k, 4)
        gamma = jax.random.uniform(k1, (c,), jnp.float32, 0.5, 1.5)
        beta = 0.1 * jax.random.normal(k2, (c,), jnp.float32)
        mean = 0.1 * jax.random.normal(k3, (c,), jnp.float32)
        var = jax.random.uniform(k4, (c,), jnp.float32, 0.5, 1.5)
        return (gamma, beta, mean, var)

    return {
        'w1': 0.1 * jax.random.normal(ks[0], (planes, in_planes, 1, 1), jnp.float32),
        'bn1': bn_stats(ks[1], planes),
        'w2': 0.1 * jax.random.normal(ks[2], (planes, planes, 3, 3), jnp.float32),
        'bn2': bn_stats(ks[3], planes),
        'w3': 0.1 * jax.random.normal(ks[4], (out_planes, planes, 1, 1), jnp.float32),
        'bn3': bn_stats(ks[5], out_planes),
        'ws': 0.1 * jax.random.normal(ks[6], (out_planes, in_planes, 1, 1), jnp.float32),
        'bns': bn_stats(ks[7], out_planes),
    }


if __name__ == "__main__":
    key = jax.random.PRNGKey(0)

    # --- case 1: projection shortcut, stride 2, is_last=True -------------
    k_in, k_par, key = jax.random.split(key, 3)
    N, in_planes, H, W = 2, 16, 8, 8
    planes, stride, is_last = 8, 2, True
    x = jax.random.normal(k_in, (N, in_planes, H, W), jnp.float32)
    params = make_params(k_par, in_planes, planes)

    out, preact = bottleneck_forward(x, params, stride, is_last)
    out = jax.block_until_ready(out)
    preact = jax.block_until_ready(preact)
    ref_out, ref_preact = ref_forward(x, params, stride, in_planes, planes)
    assert out.shape == ref_out.shape and preact.shape == ref_preact.shape
    # bf16 MXU inputs -> relaxed tolerance vs. the f32 reference.
    assert jnp.allclose(out, ref_out, atol=2e-2, rtol=2e-2)
    assert jnp.allclose(preact, ref_preact, atol=2e-2, rtol=2e-2)

    # --- case 2: identity shortcut, stride 1, is_last=False --------------
    k_in, k_par = jax.random.split(key)
    N, in_planes, H, W = 2, 32, 8, 8
    planes, stride, is_last = 8, 1, False
    x = jax.random.normal(k_in, (N, in_planes, H, W), jnp.float32)
    params = make_params(k_par, in_planes, planes)

    out = bottleneck_forward(x, params, stride, is_last)
    out = jax.block_until_ready(out)
    ref_out, _ = ref_forward(x, params, stride, in_planes, planes)
    assert out.shape == ref_out.shape
    assert jnp.allclose(out, ref_out, atol=2e-2, rtol=2e-2)

    print("KERNEL_OK")
</pallas_src>

<mosaic_0001>
module attributes {stable_mosaic.version = 11 : i64} {
  func.func @kernel(%arg0: i32, %arg1: i32, %arg2: i32, %arg3: memref<128x128xbf16, #tpu.memory_space<vmem>>, %arg4: memref<128x128xbf16, #tpu.memory_space<vmem>>, %arg5: memref<1x128xf32, #tpu.memory_space<vmem>>, %arg6: memref<128x128xbf16, #tpu.memory_space<vmem>>, %arg7: memref<128x128xf32, #tpu.memory_space<vmem>>) attributes {dimension_semantics = [#tpu.dimension_semantics<parallel>, #tpu.dimension_semantics<parallel>, #tpu.dimension_semantics<arbitrary>], iteration_bounds = array<i64: 1, 1, 1>, scalar_prefetch = 0 : i64, scratch_operands = 1 : i64, tpu.core_type = #tpu.core_type<tc>, window_params = [{transform_indices = @transform_0, window_bounds = array<i64: 128, 128>}, {transform_indices = @transform_1, window_bounds = array<i64: 128, 128>}, {transform_indices = @transform_2, window_bounds = array<i64: 1, 128>}, {transform_indices = @transform_3, window_bounds = array<i64: 128, 128>}]} {
    %c0_i32 = arith.constant 0 : i32
    %0 = arith.cmpi eq, %arg2, %c0_i32 : i32
    %1 = arith.extui %0 : i1 to i32
    %c0_i32_0 = arith.constant 0 : i32
    %2 = arith.cmpi ne, %1, %c0_i32_0 : i32
    scf.if %2 {
      %cst_10 = arith.constant 0.000000e+00 : f32
      %12 = vector.broadcast %cst_10 : f32 to vector<128x128xf32>
      %c0_11 = arith.constant 0 : index
      %c0_12 = arith.constant 0 : index
      %13 = vector.load %arg7[%c0_11, %c0_12] : memref<128x128xf32, #tpu.memory_space<vmem>>, vector<128x128xf32>
      tpu.vector_store %arg7[%c0_11, %c0_12], %12 {strides = array<i32>} : memref<128x128xf32, #tpu.memory_space<vmem>>, vector<128x128xf32>,
    } else {
    }
    %c0 = arith.constant 0 : index
    %c0_1 = arith.constant 0 : index
    %3 = vector.load %arg7[%c0, %c0_1] : memref<128x128xf32, #tpu.memory_space<vmem>>, vector<128x128xf32>
    %c0_2 = arith.constant 0 : index
    %c0_3 = arith.constant 0 : index
    %4 = vector.load %arg3[%c0_2, %c0_3] : memref<128x128xbf16, #tpu.memory_space<vmem>>, vector<128x128xbf16>
    %c0_4 = arith.constant 0 : index
    %c0_5 = arith.constant 0 : index
    %5 = vector.load %arg4[%c0_4, %c0_5] : memref<128x128xbf16, #tpu.memory_space<vmem>>, vector<128x128xbf16>
    %cst = arith.constant dense<0.000000e+00> : vector<128x128xf32>
    %6 = tpu.matmul %4, %5, %cst {dimension_numbers = #tpu.dot_dimension_numbers<[1], [0], [0], [1], [0, 0, 1, 1], [], []>} : vector<128x128xbf16>, vector<128x128xbf16>, vector<128x128xf32> -> vector<128x128xf32>
    %7 = arith.addf %3, %6 : vector<128x128xf32>
    %c0_6 = arith.constant 0 : index
    %c0_7 = arith.constant 0 : index
    %8 = vector.load %arg7[%c0_6, %c0_7] : memref<128x128xf32, #tpu.memory_space<vmem>>, vector<128x128xf32>
    tpu.vector_store %arg7[%c0_6, %c0_7], %7 {strides = array<i32>} : memref<128x128xf32, #tpu.memory_space<vmem>>, vector<128x128xf32>,
    %c0_i32_8 = arith.constant 0 : i32
    %9 = arith.cmpi eq, %arg2, %c0_i32_8 : i32
    %10 = arith.extui %9 : i1 to i32
    %c0_i32_9 = arith.constant 0 : i32
    %11 = arith.cmpi ne, %10, %c0_i32_9 : i32
    scf.if %11 {
      %c0_10 = arith.constant 0 : index
      %c0_11 = arith.constant 0 : index
      %12 = vector.load %arg7[%c0_10, %c0_11] : memref<128x128xf32, #tpu.memory_space<vmem>>, vector<128x128xf32>
      %c0_12 = arith.constant 0 : index
      %c0_13 = arith.constant 0 : index
      %13 = vector.load %arg5[%c0_12, %c0_13] : memref<1x128xf32, #tpu.memory_space<vmem>>, vector<1x128xf32>
      %14 = vector.broadcast %13 : vector<1x128xf32> to vector<128x128xf32>
      %15 = arith.addf %12, %14 : vector<128x128xf32>
      %cst_14 = arith.constant 0.000000e+00 : f32
      %16 = vector.broadcast %cst_14 : f32 to vector<128x128xf32>
      %17 = arith.maximumf %15, %16 : vector<128x128xf32>
      %18 = arith.truncf %17 : vector<128x128xf32> to vector<128x128xbf16>
      %c0_15 = arith.constant 0 : index
      %c0_16 = arith.constant 0 : index
      %19 = vector.load %arg6[%c0_15, %c0_16] : memref<128x128xbf16, #tpu.memory_space<vmem>>, vector<128x128xbf16>
      tpu.vector_store %arg6[%c0_15, %c0_16], %18 {strides = array<i32>} : memref<128x128xbf16, #tpu.memory_space<vmem>>, vector<128x128xbf16>,
    } else {
    }
    return
  }
  func.func @transform_0(%arg0: i32, %arg1: i32, %arg2: i32) -> (i32, i32) {
    %c0_i32 = arith.constant 0 : i32
    return %arg0, %arg2 : i32, i32
  }
  func.func @transform_1(%arg0: i32, %arg1: i32, %arg2: i32) -> (i32, i32) {
    %c0_i32 = arith.constant 0 : i32
    return %arg2, %arg1 : i32, i32
  }
  func.func @transform_2(%arg0: i32, %arg1: i32, %arg2: i32) -> (i32, i32) {
    %c0_i32 = arith.constant 0 : i32
    %c0_i32_0 = arith.constant 0 : i32
    return %c0_i32, %arg1 : i32, i32
  }
  func.func @transform_3(%arg0: i32, %arg1: i32, %arg2: i32) -> (i32, i32) {
    %c0_i32 = arith.constant 0 : i32
    return %arg0, %arg1 : i32, i32
  }
}

</mosaic_0001>

<bundles_post_ra>
// kernel: tpu_custom_call.1
= control target key start
LH: loop header
LB: loop body
LE: loop exit
PB: predicated region body
PF: predicated region fallthrough
CT: control target
= control target key end

     0   :  { %8 = vsyncpa [#allocation4], 0  ;;  %s819_s0 = inlined_call_operand.hbm [shape: bf16[128,128], index: 0, kind: input, shape index: {}]   ;;  %s820_s1 = inlined_call_operand.hbm [shape: bf16[128,128], index: 1, kind: input, shape index: {}]   ;;  %s821_s2 = inlined_call_operand.vmem [shape: f32[1,128], index: 2, kind: input, shape index: {}]   ;;  %s822_s3 = inlined_call_operand.hbm [shape: bf16[128,128], index: 3, kind: output, shape index: {}]  }
   0x1   :  { %9 = vsyncpa [#allocation7], 0 }
   0x2   :  { %10 = vsyncpa [#allocation5], 0  ;;  %s746_s12 = smov [#allocation3]   ;;  %s674_s16 = scalar_lea.hbm %s819_s0, 1024 }
   0x3   :  { %s16_s13 = sshll.u32 %s746_s12, 4  ;;  %p675_p0 = scmp.ne.s32.totalorder %s819_s0, %s674_s16  ;;  %s17_s13 = int_to_ptr.vmem [resolvable:$true] %s16_s13 }
   0x4   :  { %p678_p1 = scmp.lt.u32.totalorder %s674_s16, %s819_s0 }
   0x6   :  { %p680_p2 = pnand %p678_p1, %p675_p0 }
   0x8   :  { %683 = shalt.err (!%p680_p2)
}
   0x9   :  { %s684_s21 = scalar_lea.vmem %s17_s13, 1024  ;;  %p689_p4 = scmp.lt.s32.totalorder %s17_s13, %s17_s13 }
   0xa   :  { %p685_p3 = scmp.ne.s32.totalorder %s17_s13, %s684_s21  ;;  %p690_p5 = scmp.lt.s32.totalorder %s684_s21, %s684_s21 }
   0xc   :  { %p691_p6 = por %p690_p5, %p689_p4 }
   0xe   :  { %p692_p7 = pnand %p691_p6, %p685_p3 }
  0x10   :  { %695 = shalt.err (!%p692_p7)
}
  0x11   :  { %s747_s22 = smov 64   ;;  %s748_s23 = smov 4  }
  0x12   :  { %22 = dma.hbm_to_vmem [thread:$0]  %s819_s0, 1024, %s17_s13, [#allocation4], %s747_s22, %s747_s22, %s748_s23  }
  0x13   :  { %s749_s26 = smov [#allocation6]   ;;  %s696_s30 = scalar_lea.hbm %s820_s1, 1024 }
  0x14   :  { %s28_s27 = sshll.u32 %s749_s26, 4  ;;  %p697_p8 = scmp.ne.s32.totalorder %s820_s1, %s696_s30  ;;  %s29_s27 = int_to_ptr.vmem [resolvable:$true] %s28_s27 }
  0x15   :  { %p700_p9 = scmp.lt.u32.totalorder %s696_s30, %s820_s1 }
  0x17   :  { %p702_p10 = pnand %p700_p9, %p697_p8 }
  0x19   :  { %705 = shalt.err (!%p702_p10)
}
  0x1a   :  { %s706_s8 = scalar_lea.vmem %s29_s27, 1024  ;;  %p711_p12 = scmp.lt.s32.totalorder %s29_s27, %s29_s27 }
  0x1b   :  { %p707_p11 = scmp.ne.s32.totalorder %s29_s27, %s706_s8  ;;  %p712_p13 = scmp.lt.s32.totalorder %s706_s8, %s706_s8 }
  0x1d   :  { %p713_p0 = por %p712_p13, %p711_p12 }
  0x1f   :  { %p714_p1 = pnand %p713_p0, %p707_p11 }
  0x21   :  { %717 = shalt.err (!%p714_p1)
}
  0x22   :  { %34 = dma.hbm_to_vmem [thread:$0]  %s820_s1, 1024, %s29_s27, [#allocation7], %s747_s22, %s747_s22, %s748_s23  }
  0x23   :  { %740 = dma.done.wait [#allocation4], 1024  }
  0x24   :  { %741 = vsyncadd [#allocation4], 4294966272 }
  0x25   :  { %742 = dma.done.wait [#allocation7], 1024  }
  0x26   :  { %743 = vsyncadd [#allocation7], 4294966272  ;;  %v658_v0 = vld [vmem:[#allocation6] sm:$0xff]   ;;  %v659_v1 = vld [vmem:[#allocation6 + $0x8] sm:$0xff]  }
  0x27   :  { %605 = vmatprep.subr.bf16.mxu0 %v658_v0  ;;  %637 = vmatprep.subr.bf16.mxu1 %v658_v0  ;;  %v660_v2 = vld [vmem:[#allocation6 + $0x10] sm:$0xff]   ;;  %v661_v3 = vld [vmem:[#allocation6 + $0x18] sm:$0xff]   ;;  %v666_v4 = vld [vmem:[#allocation3] sm:$0xff]  }
  0x28   :  { %606 = vmatpush3.bf16.msra.mxu0 %v658_v0  ;;  %645 = vmatpush3.bf16.msra.mxu1 %v658_v0  ;;  %v667_v5 = vld [vmem:[#allocation3 + $0x20] sm:$0xff]   ;;  %v663_v7 = vld [vmem:[#allocation6 + $0x28] sm:$0xff]   ;;  %v664_v8 = vld [vmem:[#allocation6 + $0x30] sm:$0xff]  }
  0x29   :  { %607 = vmatprep.subr.bf16.mxu0 %v659_v1  ;;  %638 = vmatprep.subr.bf16.mxu1 %v659_v1  ;;  %v662_v6 = vld [vmem:[#allocation6 + $0x20] sm:$0xff]   ;;  %v665_v9 = vld [vmem:[#allocation6 + $0x38] sm:$0xff]   ;;  %v668_v10 = vld [vmem:[#allocation3 + $0x8] sm:$0xff]  }
  0x2a   :  { %621 = vmatprep.mubr.bf16.mxu0 %v666_v4  ;;  %629 = vmatprep.mubr.bf16.mxu1 %v667_v5  ;;  %v669_v11 = vld [vmem:[#allocation3 + $0x28] sm:$0xff]   ;;  %v670_v12 = vld [vmem:[#allocation3 + $0x10] sm:$0xff]   ;;  %v672_v14 = vld [vmem:[#allocation3 + $0x18] sm:$0xff]  }
  0x2b   :  { %v671_v13 = vld [vmem:[#allocation3 + $0x30] sm:$0xff]   ;;  %v673_v15 = vld [vmem:[#allocation3 + $0x38] sm:$0xff]   ;;  %v509_v16 = vld [vmem:[%s821_s2] ss:$0 sm:$0xff]  ;;  %s750_s2 = smov [#allocation8]  }
  0x2c   :  { %608 = vmatpush3.bf16.msra.mxu0 %v659_v1  ;;  %646 = vmatpush3.bf16.msra.mxu1 %v659_v1  ;;  %s480_s11 = sshll.u32 %s750_s2, 4  ;;  %s481_s11 = int_to_ptr.vmem [resolvable:$true] %s480_s11 }
  0x2d   :  { %609 = vmatprep.subr.bf16.mxu0 %v660_v2  ;;  %639 = vmatprep.subr.bf16.mxu1 %v660_v2  ;;  %s718_s12 = scalar_lea.vmem %s481_s11, 1024  ;;  %p723_p3 = scmp.lt.s32.totalorder %s481_s11, %s481_s11 }
  0x2e   :  { %p719_p2 = scmp.ne.s32.totalorder %s481_s11, %s718_s12  ;;  %p724_p4 = scmp.lt.s32.totalorder %s718_s12, %s718_s12 }
  0x30   :  { %610 = vmatpush3.bf16.msra.mxu0 %v660_v2  ;;  %647 = vmatpush3.bf16.msra.mxu1 %v660_v2  ;;  %p725_p5 = por %p724_p4, %p723_p3 }
  0x31   :  { %611 = vmatprep.subr.bf16.mxu0 %v661_v3  ;;  %640 = vmatprep.subr.bf16.mxu1 %v661_v3 }
  0x32   :  { %p726_p6 = pnand %p725_p5, %p719_p2 }
  0x34   :  { %612 = vmatpush3.bf16.msra.mxu0 %v661_v3  ;;  %648 = vmatpush3.bf16.msra.mxu1 %v661_v3 }
  0x35   :  { %613 = vmatprep.subr.bf16.mxu0 %v662_v6  ;;  %641 = vmatprep.subr.bf16.mxu1 %v662_v6 }
  0x38   :  { %614 = vmatpush3.bf16.msra.mxu0 %v662_v6  ;;  %649 = vmatpush3.bf16.msra.mxu1 %v662_v6 }
  0x39   :  { %615 = vmatprep.subr.bf16.mxu0 %v663_v7  ;;  %642 = vmatprep.subr.bf16.mxu1 %v663_v7 }
  0x3c   :  { %616 = vmatpush3.bf16.msra.mxu0 %v663_v7  ;;  %650 = vmatpush3.bf16.msra.mxu1 %v663_v7 }
  0x3d   :  { %617 = vmatprep.subr.bf16.mxu0 %v664_v8  ;;  %643 = vmatprep.subr.bf16.mxu1 %v664_v8 }
  0x40   :  { %618 = vmatpush3.bf16.msra.mxu0 %v664_v8  ;;  %651 = vmatpush3.bf16.msra.mxu1 %v664_v8 }
  0x41   :  { %619 = vmatprep.subr.bf16.mxu0 %v665_v9  ;;  %644 = vmatprep.subr.bf16.mxu1 %v665_v9 }
  0x44   :  { %620 = vmatpush3.bf16.msra.mxu0 %v665_v9  ;;  %652 = vmatpush3.bf16.msra.mxu1 %v665_v9 }
  0x47   :  { %622 = vmatmul.mubr.bf16.vlgmr.msra.gmra.mrb[0].mxu0 %v668_v10  ;;  %630 = vmatmul.mubr.bf16.vlgmr.msra.gmra.mrb[0].mxu1 %v669_v11 }
  0x48   :  { %625 = vmatprep.mubr.bf16.mxu0 %v670_v12  ;;  %633 = vmatprep.mubr.bf16.mxu1 %v671_v13 }
  0x4f   :  { %626 = vmatmul.mubr.bf16.gmra.mrb[4].mxu0 %v672_v14  ;;  %634 = vmatmul.mubr.bf16.gmra.mrb[4].mxu1 %v673_v15 }
 0x11a   :  { %v623_v17 = vpop.f32.mrb[0].mxu0  ;;  %v631_v18 = vpop.f32.mrb[0].mxu1 }
 0x11b   :  { %v365_v19 = vadd.f32 %v623_v17, %v509_v16  ;;  %v373_v20 = vadd.f32 %v631_v18, %v509_v16  ;;  %v242_v21 = vpop.f32.mrb[1].mxu0  ;;  %v274_v22 = vpop.f32.mrb[1].mxu1 }
 0x11c   :  { %v363_v23 = vadd.f32 %v509_v16, %v242_v21  ;;  %v371_v24 = vadd.f32 %v509_v16, %v274_v22  ;;  %v624_v25 = vpop.f32.mrb[2].mxu0  ;;  %v632_v26 = vpop.f32.mrb[2].mxu1 }
 0x11d   :  { %v366_v27 = vadd.f32 %v624_v25, %v509_v16  ;;  %v374_v28 = vadd.f32 %v632_v26, %v509_v16  ;;  %v245_v29 = vpop.f32.mrb[3].mxu0  ;;  %v277_v30 = vpop.f32.mrb[3].mxu1  ;;  %v381_v33 = vmax.f32 %v365_v19, 0.0  ;;  %v389_v34 = vmax.f32 %v373_v20, 0.0 }
 0x11e   :  { %v364_v31 = vadd.f32 %v509_v16, %v245_v29  ;;  %v372_v32 = vadd.f32 %v509_v16, %v277_v30  ;;  %v379_v37 = vmax.f32 %v363_v23, 0.0  ;;  %v387_v38 = vmax.f32 %v371_v24, 0.0 }
 0x11f   :  { %v382_v35 = vmax.f32 %v366_v27, 0.0  ;;  %v390_v36 = vmax.f32 %v374_v28, 0.0 }
 0x120   :  { %v380_v39 = vmax.f32 %v364_v31, 0.0  ;;  %v388_v40 = vmax.f32 %v372_v32, 0.0 }
 0x121   :  { %v550_v41 = vpack.c.bf16 %v382_v35, %v381_v33  ;;  %v570_v42 = vpack.c.bf16 %v390_v36, %v389_v34 }
 0x122   :  { %v545_v43 = vpack.c.bf16 %v380_v39, %v379_v37  ;;  %v565_v44 = vpack.c.bf16 %v388_v40, %v387_v38  ;;  %v627_v45 = vpop.f32.mrb[4].mxu0  ;;  %v635_v46 = vpop.f32.mrb[4].mxu1 }
 0x123   :  { %582 = vst [vmem:[#allocation8 + $0x8] sm:$0xff] %v550_v41   ;;  %586 = vst [vmem:[#allocation8 + $0x28] sm:$0xff] %v570_v42   ;;  %v369_v47 = vadd.f32 %v627_v45, %v509_v16  ;;  %v377_v48 = vadd.f32 %v635_v46, %v509_v16  ;;  %v258_v49 = vpop.f32.mrb[5].mxu0  ;;  %v290_v50 = vpop.f32.mrb[5].mxu1 }
 0x124   :  { %546 = vst [vmem:[#allocation8] sm:$0xff] %v545_v43   ;;  %585 = vst [vmem:[#allocation8 + $0x20] sm:$0xff] %v565_v44   ;;  %v367_v51 = vadd.f32 %v509_v16, %v258_v49  ;;  %v375_v52 = vadd.f32 %v509_v16, %v290_v50  ;;  %v628_v53 = vpop.f32.mrb[6].mxu0  ;;  %v636_v54 = vpop.f32.mrb[6].mxu1 }
 0x125   :  { %v370_v55 = vadd.f32 %v628_v53, %v509_v16  ;;  %v378_v56 = vadd.f32 %v636_v54, %v509_v16  ;;  %v261_v57 = vpop.f32.mrb[7].mxu0  ;;  %v293_v58 = vpop.f32.mrb[7].mxu1  ;;  %v385_v61 = vmax.f32 %v369_v47, 0.0  ;;  %v393_v62 = vmax.f32 %v377_v48, 0.0 }
 0x126   :  { %v368_v59 = vadd.f32 %v509_v16, %v261_v57  ;;  %v376_v60 = vadd.f32 %v509_v16, %v293_v58  ;;  %v383_v1 = vmax.f32 %v367_v51, 0.0  ;;  %v391_v2 = vmax.f32 %v375_v52, 0.0 }
 0x127   :  { %v386_v63 = vmax.f32 %v370_v55, 0.0  ;;  %v394_v0 = vmax.f32 %v378_v56, 0.0 }
 0x128   :  { %v384_v3 = vmax.f32 %v368_v59, 0.0  ;;  %v392_v4 = vmax.f32 %v376_v60, 0.0 }
 0x129   :  { %v560_v5 = vpack.c.bf16 %v386_v63, %v385_v61  ;;  %v580_v6 = vpack.c.bf16 %v394_v0, %v393_v62 }
 0x12a   :  { %v555_v7 = vpack.c.bf16 %v384_v3, %v383_v1  ;;  %v575_v8 = vpack.c.bf16 %v392_v4, %v391_v2 }
 0x12b   :  { %584 = vst [vmem:[#allocation8 + $0x18] sm:$0xff] %v560_v5   ;;  %588 = vst [vmem:[#allocation8 + $0x38] sm:$0xff] %v580_v6  }
 0x12c   :  { %583 = vst [vmem:[#allocation8 + $0x10] sm:$0xff] %v555_v7   ;;  %587 = vst [vmem:[#allocation8 + $0x30] sm:$0xff] %v575_v8  }
 0x12d   :  { %729 = shalt.err (!%p726_p6)
}
 0x12e   :  { %s730_s15 = scalar_lea.hbm %s822_s3, 1024 }
 0x12f   :  { %p731_p7 = scmp.ne.s32.totalorder %s822_s3, %s730_s15  ;;  %p734_p8 = scmp.lt.u32.totalorder %s730_s15, %s822_s3 }
 0x131   :  { %p736_p9 = pnand %p734_p8, %p731_p7 }
 0x133   :  { %739 = shalt.err (!%p736_p9)
}
 0x134   :  { %486 = dma.vmem_to_hbm [thread:$0]  %s481_s11, 1024, %s822_s3, [#allocation5], %s747_s22, %s747_s22, %s748_s23  }
 0x135   :  { %744 = dma.done.wait [#allocation5], 1024  }
 0x136   :  { %745 = vsyncadd [#allocation5], 4294966272 }
 0x137   :  { %490 = vsyncpa [#allocation4], 1 }
 0x138   :  { %491 = vsyncpa [#allocation7], 1 }
 0x139   :  { %492 = vsyncpa [#allocation5], 1 }

</bundles_post_ra>
